<compile_context>
chip_gen: v7x
topology: tpu7x:2x2x1
jax: 0.10.0
libtpu: 0.0.40
codegen_flags: <defaults>
</compile_context>

<pallas_src>
import math

import jax
import jax.numpy as jnp
from jax.experimental import pallas as pl
from jax.experimental.pallas import tpu as pltpu

IN_FEATURES = 14 * 8 * 8   # 896 (multiple of 128 -> lane-dense input tiles)
HIDDEN = 128               # padded hidden width (lane-dense)


def _mlp_kernel(x_ref,
                w1_ref, b1_ref,
                w2_ref, b2_ref,
                w3_ref, b3_ref,
                w4_ref, b4_ref,
                w5_ref, b5_ref,
                out_ref):
    """One batch tile of the 5-layer MLP.  Hidden dims are padded to 128 lanes.

    x arrives in f32 (straight from HBM, no wrapper-side cast pass) and is cast
    to the weights' compute dtype in VMEM.  Weights are bf16 (or f32), biases
    and accumulators f32.  Padded weight columns / bias lanes are zero, so
    padded activation lanes stay exactly zero through every relu and contribute
    nothing to the real outputs."""
    cdt = w1_ref.dtype  # compute dtype for MXU operands

    # fc1 + relu (896 -> 128): ~95% of FLOPs and nearly all HBM traffic.
    # In-kernel f32 -> bf16 cast of the activation stream (VPU work, hidden
    # under the input DMA).
    x = x_ref[...].astype(cdt)
    h = jnp.dot(x, w1_ref[...], preferred_element_type=jnp.float32)
    h = jnp.maximum(h + b1_ref[...], 0.0)

    # fc2..fc4 + relu (padded to 128 output lanes).
    for w_ref, b_ref in ((w2_ref, b2_ref), (w3_ref, b3_ref), (w4_ref, b4_ref)):
        h = jnp.dot(h.astype(cdt), w_ref[...], preferred_element_type=jnp.float32)
        h = jnp.maximum(h + b_ref[...], 0.0)

    # fc5 (no activation), single real output column.
    y = jnp.dot(h.astype(cdt), w5_ref[...], preferred_element_type=jnp.float32)
    out_ref[...] = (y + b5_ref[...]).astype(out_ref.dtype)


def _round_up(n, m):
    return ((n + m - 1) // m) * m


def chess_net_forward(x, params, *, block_b=2048, use_bf16=True):
    """x: (B, 14, 8, 8) float32.  Returns (B, 1) float32."""
    B = x.shape[0]
    # Contiguous reshape == nn.Flatten on NCHW; no data movement.
    x_flat = x.reshape(B, IN_FEATURES).astype(jnp.float32)

    cdt = jnp.bfloat16 if use_bf16 else jnp.float32

    (w1, b1), (w2, b2), (w3, b3), (w4, b4), (w5, b5) = params

    def pad_w(w, rows, cols):
        return jnp.pad(w, ((0, rows - w.shape[0]), (0, cols - w.shape[1])))

    def pad_b(b, cols):
        return jnp.pad(b, ((0, 0), (0, cols - b.shape[1])))

    # Weights in compute dtype (zero-padded to lane-dense hidden width);
    # biases stay f32.  Total < 0.4 MiB -> resident in VMEM across the grid.
    w1p = w1.astype(cdt)                          # (896, 128)
    w2p = pad_w(w2, HIDDEN, HIDDEN).astype(cdt)   # (128, 128)
    w3p = pad_w(w3, HIDDEN, HIDDEN).astype(cdt)   # (128, 128)
    w4p = pad_w(w4, HIDDEN, HIDDEN).astype(cdt)   # (128, 128)
    w5p = pad_w(w5, HIDDEN, 1).astype(cdt)        # (128, 1)
    b1p = b1.astype(jnp.float32)
    b2p = pad_b(b2, HIDDEN).astype(jnp.float32)
    b3p = pad_b(b3, HIDDEN).astype(jnp.float32)
    b4p = pad_b(b4, HIDDEN).astype(jnp.float32)
    b5p = b5.astype(jnp.float32)

    # --- batch tiling ------------------------------------------------------
    # Pick the tile size to minimize padding (round_up(ceil(B/num_tiles), 8),
    # 8 is enough since the input block is f32).  For B >= 512 force at least
    # 2 tiles so the "parallel" grid axis can shard across both v7x TCs.
    min_tiles = 2 if B >= 512 else 1
    num_tiles = max(min_tiles, pl.cdiv(B, block_b))
    tb = min(block_b, _round_up(pl.cdiv(B, num_tiles), 8))
    b_pad = _round_up(B, tb)
    if b_pad != B:
        x_flat = jnp.pad(x_flat, ((0, b_pad - B), (0, 0)))

    grid = (b_pad // tb,)

    def _const_spec(shape):
        # Full array, constant index_map -> fetched once, resident across grid.
        return pl.BlockSpec(shape, lambda i: (0,) * len(shape))

    weights = (w1p, b1p, w2p, b2p, w3p, b3p, w4p, b4p, w5p, b5p)

    # Triple-buffer the activation stream when the grid is long enough for it
    # to matter (hides DMA issue latency; ~7 MiB extra VMEM at TB=2048).
    x_index_map = lambda i: (i, 0)
    x_spec = pl.BlockSpec((tb, IN_FEATURES), x_index_map)
    if grid[0] > 2:
        try:
            x_spec = pl.BlockSpec((tb, IN_FEATURES), x_index_map,
                                  pipeline_mode=pl.Buffered(3))
        except TypeError:
            pass  # older jax without pipeline_mode kwarg: default double-buffer

    in_specs = [x_spec]
    in_specs += [_const_spec(w.shape) for w in weights]

    flops = 2 * b_pad * (IN_FEATURES * HIDDEN + 3 * HIDDEN * HIDDEN + HIDDEN)
    w_bytes = sum(int(w.size) * w.dtype.itemsize for w in weights)
    bytes_accessed = int(x_flat.size) * 4 + w_bytes + b_pad * 4

    out = pl.pallas_call(
        _mlp_kernel,
        out_shape=jax.ShapeDtypeStruct((b_pad, 1), jnp.float32),
        grid=grid,
        in_specs=in_specs,
        out_specs=pl.BlockSpec((tb, 1), lambda i: (i, 0)),
        compiler_params=pltpu.CompilerParams(
            dimension_semantics=("parallel",),
            vmem_limit_bytes=40 << 20,
        ),
        cost_estimate=pl.CostEstimate(
            flops=flops, transcendentals=0, bytes_accessed=bytes_accessed),
    )(x_flat, *weights)

    return out[:B]


def init_params(key):
    """Deterministic init mimicking PyTorch Linear default (uniform +-1/sqrt(fan_in)).

    Weights are stored already transposed: (in_features, out_features)."""
    dims = [(IN_FEATURES, 128), (128, 64), (64, 32), (32, 16), (16, 1)]
    params = []
    for (fan_in, fan_out) in dims:
        key, kw, kb = jax.random.split(key, 3)
        bound = 1.0 / math.sqrt(fan_in)
        w = jax.random.uniform(kw, (fan_in, fan_out), jnp.float32, -bound, bound)
        b = jax.random.uniform(kb, (1, fan_out), jnp.float32, -bound, bound)
        params.append((w, b))
    return params


def reference_forward(x, params, *, cast_dtype=None):
    """Plain-JAX reference.  If cast_dtype is set, mirror the kernel's
    bf16-operand / f32-accumulate arithmetic for a tight comparison."""
    h = x.reshape(x.shape[0], -1)
    if cast_dtype is not None:
        h = h.astype(cast_dtype)
    for i, (w, b) in enumerate(params):
        wc = w.astype(cast_dtype) if cast_dtype is not None else w
        h = jnp.dot(h, wc, preferred_element_type=jnp.float32) + b
        if i < len(params) - 1:
            h = jnp.maximum(h, 0.0)
            if cast_dtype is not None:
                h = h.astype(cast_dtype)
    return h.astype(jnp.float32)


if __name__ == "__main__":
    key = jax.random.PRNGKey(0)
    k_x, k_p = jax.random.split(key)

    B = 2
    x = jax.random.normal(k_x, (B, 14, 8, 8), jnp.float32)
    params = init_params(k_p)

    out = jax.block_until_ready(chess_net_forward(x, params))
    assert out.shape == (B, 1), out.shape

    # Tight check against a reference that uses the same bf16-operand /
    # f32-accumulate arithmetic, plus a loose sanity check against pure f32.
    ref_bf16 = reference_forward(x, params, cast_dtype=jnp.bfloat16)
    ref_f32 = reference_forward(x, params)
    assert jnp.allclose(out, ref_bf16, atol=1e-3, rtol=1e-3), (out, ref_bf16)
    assert jnp.allclose(out, ref_f32, atol=5e-2, rtol=5e-2), (out, ref_f32)

    print("KERNEL_OK")
</pallas_src>

<mosaic_0001>
module attributes {stable_mosaic.version = 11 : i64} {
  func.func @_mlp_kernel(%arg0: i32, %arg1: memref<8x896xf32, #tpu.memory_space<vmem>>, %arg2: memref<896x128xbf16, #tpu.memory_space<vmem>>, %arg3: memref<1x128xf32, #tpu.memory_space<vmem>>, %arg4: memref<128x128xbf16, #tpu.memory_space<vmem>>, %arg5: memref<1x128xf32, #tpu.memory_space<vmem>>, %arg6: memref<128x128xbf16, #tpu.memory_space<vmem>>, %arg7: memref<1x128xf32, #tpu.memory_space<vmem>>, %arg8: memref<128x128xbf16, #tpu.memory_space<vmem>>, %arg9: memref<1x128xf32, #tpu.memory_space<vmem>>, %arg10: memref<128x1xbf16, #tpu.memory_space<vmem>>, %arg11: memref<1x1xf32, #tpu.memory_space<vmem>>, %arg12: memref<8x1xf32, #tpu.memory_space<vmem>>) attributes {dimension_semantics = [#tpu.dimension_semantics<parallel>], iteration_bounds = array<i64: 1>, scalar_prefetch = 0 : i64, scratch_operands = 0 : i64, tpu.core_type = #tpu.core_type<tc>, window_params = [{transform_indices = @transform_0, window_bounds = array<i64: 8, 896>}, {pipeline_mode = #tpu.pipeline_mode<synchronous>, transform_indices = @transform_1, window_bounds = array<i64: 896, 128>}, {pipeline_mode = #tpu.pipeline_mode<synchronous>, transform_indices = @transform_2, window_bounds = array<i64: 1, 128>}, {pipeline_mode = #tpu.pipeline_mode<synchronous>, transform_indices = @transform_3, window_bounds = array<i64: 128, 128>}, {pipeline_mode = #tpu.pipeline_mode<synchronous>, transform_indices = @transform_4, window_bounds = array<i64: 1, 128>}, {pipeline_mode = #tpu.pipeline_mode<synchronous>, transform_indices = @transform_5, window_bounds = array<i64: 128, 128>}, {pipeline_mode = #tpu.pipeline_mode<synchronous>, transform_indices = @transform_6, window_bounds = array<i64: 1, 128>}, {pipeline_mode = #tpu.pipeline_mode<synchronous>, transform_indices = @transform_7, window_bounds = array<i64: 128, 128>}, {pipeline_mode = #tpu.pipeline_mode<synchronous>, transform_indices = @transform_8, window_bounds = array<i64: 1, 128>}, {pipeline_mode = #tpu.pipeline_mode<synchronous>, transform_indices = @transform_9, window_bounds = array<i64: 128, 1>}, {pipeline_mode = #tpu.pipeline_mode<synchronous>, transform_indices = @transform_10, window_bounds = array<i64: 1, 1>}, {transform_indices = @transform_11, window_bounds = array<i64: 8, 1>}]} {
    %c0 = arith.constant 0 : index
    %c0_0 = arith.constant 0 : index
    %0 = vector.load %arg1[%c0, %c0_0] : memref<8x896xf32, #tpu.memory_space<vmem>>, vector<8x896xf32>
    %1 = arith.truncf %0 : vector<8x896xf32> to vector<8x896xbf16>
    %c0_1 = arith.constant 0 : index
    %c0_2 = arith.constant 0 : index
    %2 = vector.load %arg2[%c0_1, %c0_2] : memref<896x128xbf16, #tpu.memory_space<vmem>>, vector<896x128xbf16>
    %cst = arith.constant dense<0.000000e+00> : vector<8x128xf32>
    %3 = tpu.matmul %1, %2, %cst {dimension_numbers = #tpu.dot_dimension_numbers<[1], [0], [0], [1], [0, 0, 1, 1], [], []>} : vector<8x896xbf16>, vector<896x128xbf16>, vector<8x128xf32> -> vector<8x128xf32>
    %c0_3 = arith.constant 0 : index
    %c0_4 = arith.constant 0 : index
    %4 = vector.load %arg3[%c0_3, %c0_4] : memref<1x128xf32, #tpu.memory_space<vmem>>, vector<1x128xf32>
    %5 = vector.broadcast %4 : vector<1x128xf32> to vector<8x128xf32>
    %6 = arith.addf %3, %5 : vector<8x128xf32>
    %cst_5 = arith.constant 0.000000e+00 : f32
    %7 = vector.broadcast %cst_5 : f32 to vector<8x128xf32>
    %8 = arith.maximumf %6, %7 : vector<8x128xf32>
    %9 = arith.truncf %8 : vector<8x128xf32> to vector<8x128xbf16>
    %c0_6 = arith.constant 0 : index
    %c0_7 = arith.constant 0 : index
    %10 = vector.load %arg4[%c0_6, %c0_7] : memref<128x128xbf16, #tpu.memory_space<vmem>>, vector<128x128xbf16>
    %cst_8 = arith.constant dense<0.000000e+00> : vector<8x128xf32>
    %11 = tpu.matmul %9, %10, %cst_8 {dimension_numbers = #tpu.dot_dimension_numbers<[1], [0], [0], [1], [0, 0, 1, 1], [], []>} : vector<8x128xbf16>, vector<128x128xbf16>, vector<8x128xf32> -> vector<8x128xf32>
    %c0_9 = arith.constant 0 : index
    %c0_10 = arith.constant 0 : index
    %12 = vector.load %arg5[%c0_9, %c0_10] : memref<1x128xf32, #tpu.memory_space<vmem>>, vector<1x128xf32>
    %13 = vector.broadcast %12 : vector<1x128xf32> to vector<8x128xf32>
    %14 = arith.addf %11, %13 : vector<8x128xf32>
    %cst_11 = arith.constant 0.000000e+00 : f32
    %15 = vector.broadcast %cst_11 : f32 to vector<8x128xf32>
    %16 = arith.maximumf %14, %15 : vector<8x128xf32>
    %17 = arith.truncf %16 : vector<8x128xf32> to vector<8x128xbf16>
    %c0_12 = arith.constant 0 : index
    %c0_13 = arith.constant 0 : index
    %18 = vector.load %arg6[%c0_12, %c0_13] : memref<128x128xbf16, #tpu.memory_space<vmem>>, vector<128x128xbf16>
    %cst_14 = arith.constant dense<0.000000e+00> : vector<8x128xf32>
    %19 = tpu.matmul %17, %18, %cst_14 {dimension_numbers = #tpu.dot_dimension_numbers<[1], [0], [0], [1], [0, 0, 1, 1], [], []>} : vector<8x128xbf16>, vector<128x128xbf16>, vector<8x128xf32> -> vector<8x128xf32>
    %c0_15 = arith.constant 0 : index
    %c0_16 = arith.constant 0 : index
    %20 = vector.load %arg7[%c0_15, %c0_16] : memref<1x128xf32, #tpu.memory_space<vmem>>, vector<1x128xf32>
    %21 = vector.broadcast %20 : vector<1x128xf32> to vector<8x128xf32>
    %22 = arith.addf %19, %21 : vector<8x128xf32>
    %cst_17 = arith.constant 0.000000e+00 : f32
    %23 = vector.broadcast %cst_17 : f32 to vector<8x128xf32>
    %24 = arith.maximumf %22, %23 : vector<8x128xf32>
    %25 = arith.truncf %24 : vector<8x128xf32> to vector<8x128xbf16>
    %c0_18 = arith.constant 0 : index
    %c0_19 = arith.constant 0 : index
    %26 = vector.load %arg8[%c0_18, %c0_19] : memref<128x128xbf16, #tpu.memory_space<vmem>>, vector<128x128xbf16>
    %cst_20 = arith.constant dense<0.000000e+00> : vector<8x128xf32>
    %27 = tpu.matmul %25, %26, %cst_20 {dimension_numbers = #tpu.dot_dimension_numbers<[1], [0], [0], [1], [0, 0, 1, 1], [], []>} : vector<8x128xbf16>, vector<128x128xbf16>, vector<8x128xf32> -> vector<8x128xf32>
    %c0_21 = arith.constant 0 : index
    %c0_22 = arith.constant 0 : index
    %28 = vector.load %arg9[%c0_21, %c0_22] : memref<1x128xf32, #tpu.memory_space<vmem>>, vector<1x128xf32>
    %29 = vector.broadcast %28 : vector<1x128xf32> to vector<8x128xf32>
    %30 = arith.addf %27, %29 : vector<8x128xf32>
    %cst_23 = arith.constant 0.000000e+00 : f32
    %31 = vector.broadcast %cst_23 : f32 to vector<8x128xf32>
    %32 = arith.maximumf %30, %31 : vector<8x128xf32>
    %33 = arith.truncf %32 : vector<8x128xf32> to vector<8x128xbf16>
    %c0_24 = arith.constant 0 : index
    %c0_25 = arith.constant 0 : index
    %34 = vector.load %arg10[%c0_24, %c0_25] : memref<128x1xbf16, #tpu.memory_space<vmem>>, vector<128x1xbf16>
    %cst_26 = arith.constant dense<0.000000e+00> : vector<8x1xf32>
    %35 = tpu.matmul %33, %34, %cst_26 {dimension_numbers = #tpu.dot_dimension_numbers<[1], [0], [0], [1], [0, 0, 1, 1], [], []>} : vector<8x128xbf16>, vector<128x1xbf16>, vector<8x1xf32> -> vector<8x1xf32>
    %c0_27 = arith.constant 0 : index
    %c0_28 = arith.constant 0 : index
    %36 = vector.load %arg11[%c0_27, %c0_28] : memref<1x1xf32, #tpu.memory_space<vmem>>, vector<1x1xf32>
    %37 = vector.broadcast %36 : vector<1x1xf32> to vector<8x1xf32>
    %38 = arith.addf %35, %37 : vector<8x1xf32>
    %c0_29 = arith.constant 0 : index
    %c0_30 = arith.constant 0 : index
    %39 = vector.load %arg12[%c0_29, %c0_30] : memref<8x1xf32, #tpu.memory_space<vmem>>, vector<8x1xf32>
    tpu.vector_store %arg12[%c0_29, %c0_30], %38 {strides = array<i32>} : memref<8x1xf32, #tpu.memory_space<vmem>>, vector<8x1xf32>,
    return
  }
  func.func @transform_0(%arg0: i32) -> (i32, i32) {
    %c0_i32 = arith.constant 0 : i32
    %c0_i32_0 = arith.constant 0 : i32
    return %arg0, %c0_i32 : i32, i32
  }
  func.func @transform_1(%arg0: i32) -> (i32, i32) {
    %c0_i32 = arith.constant 0 : i32
    %c0_i32_0 = arith.constant 0 : i32
    %c0_i32_1 = arith.constant 0 : i32
    return %c0_i32, %c0_i32_0 : i32, i32
  }
  func.func @transform_2(%arg0: i32) -> (i32, i32) {
    %c0_i32 = arith.constant 0 : i32
    %c0_i32_0 = arith.constant 0 : i32
    %c0_i32_1 = arith.constant 0 : i32
    return %c0_i32, %c0_i32_0 : i32, i32
  }
  func.func @transform_3(%arg0: i32) -> (i32, i32) {
    %c0_i32 = arith.constant 0 : i32
    %c0_i32_0 = arith.constant 0 : i32
    %c0_i32_1 = arith.constant 0 : i32
    return %c0_i32, %c0_i32_0 : i32, i32
  }
  func.func @transform_4(%arg0: i32) -> (i32, i32) {
    %c0_i32 = arith.constant 0 : i32
    %c0_i32_0 = arith.constant 0 : i32
    %c0_i32_1 = arith.constant 0 : i32
    return %c0_i32, %c0_i32_0 : i32, i32
  }
  func.func @transform_5(%arg0: i32) -> (i32, i32) {
    %c0_i32 = arith.constant 0 : i32
    %c0_i32_0 = arith.constant 0 : i32
    %c0_i32_1 = arith.constant 0 : i32
    return %c0_i32, %c0_i32_0 : i32, i32
  }
  func.func @transform_6(%arg0: i32) -> (i32, i32) {
    %c0_i32 = arith.constant 0 : i32
    %c0_i32_0 = arith.constant 0 : i32
    %c0_i32_1 = arith.constant 0 : i32
    return %c0_i32, %c0_i32_0 : i32, i32
  }
  func.func @transform_7(%arg0: i32) -> (i32, i32) {
    %c0_i32 = arith.constant 0 : i32
    %c0_i32_0 = arith.constant 0 : i32
    %c0_i32_1 = arith.constant 0 : i32
    return %c0_i32, %c0_i32_0 : i32, i32
  }
  func.func @transform_8(%arg0: i32) -> (i32, i32) {
    %c0_i32 = arith.constant 0 : i32
    %c0_i32_0 = arith.constant 0 : i32
    %c0_i32_1 = arith.constant 0 : i32
    return %c0_i32, %c0_i32_0 : i32, i32
  }
  func.func @transform_9(%arg0: i32) -> (i32, i32) {
    %c0_i32 = arith.constant 0 : i32
    %c0_i32_0 = arith.constant 0 : i32
    %c0_i32_1 = arith.constant 0 : i32
    return %c0_i32, %c0_i32_0 : i32, i32
  }
  func.func @transform_10(%arg0: i32) -> (i32, i32) {
    %c0_i32 = arith.constant 0 : i32
    %c0_i32_0 = arith.constant 0 : i32
    %c0_i32_1 = arith.constant 0 : i32
    return %c0_i32, %c0_i32_0 : i32, i32
  }
  func.func @transform_11(%arg0: i32) -> (i32, i32) {
    %c0_i32 = arith.constant 0 : i32
    %c0_i32_0 = arith.constant 0 : i32
    return %arg0, %c0_i32 : i32, i32
  }
}

</mosaic_0001>

<bundles_post_ra>
// kernel: tpu_custom_call.1
= control target key start
LH: loop header
LB: loop body
LE: loop exit
PB: predicated region body
PF: predicated region fallthrough
CT: control target
= control target key end

     0   :  { %s1919_s0 = inlined_call_operand.hbm [shape: f32[8,896], index: 0, kind: input, shape index: {}]   ;;  %s1920_s1 = inlined_call_operand.hbm [shape: bf16[896,128], index: 1, kind: input, shape index: {}]   ;;  %s1921_s2 = inlined_call_operand.vmem [shape: f32[1,128], index: 2, kind: input, shape index: {}]   ;;  %s1922_s3 = inlined_call_operand.vmem [shape: bf16[128,128], index: 3, kind: input, shape index: {}]   ;;  %s1923_s4 = inlined_call_operand.vmem [shape: f32[1,128], index: 4, kind: input, shape index: {}]   ;;  %s1924_s5 = inlined_call_operand.hbm [shape: bf16[128,128], index: 5, kind: input, shape index: {}]   ;;  %s1925_s6 = inlined_call_operand.vmem [shape: f32[1,128], index: 6, kind: input, shape index: {}]   ;;  %s1926_s7 = inlined_call_operand.hbm [shape: bf16[128,128], index: 7, kind: input, shape index: {}]   ;;  %s1927_s8 = inlined_call_operand.vmem [shape: f32[1,128], index: 8, kind: input, shape index: {}]   ;;  %s1928_s9 = inlined_call_operand.vmem [shape: bf16[128,1], index: 9, kind: input, shape index: {}]   ;;  %s1929_s10 = inlined_call_operand.<no memory space> [shape: f32[1,1], index: 10, kind: input, shape index: {}]   ;;  %s1930_s11 = inlined_call_operand.vmem [shape: f32[8,1], index: 11, kind: output, shape index: {}]  }
   0x1   :  { %v16_v0 = vstv %s1929_s10 }
   0x2   :  { %17 = vst [vmem:[#allocation2] sm:$0x1] %v16_v0 }
   0x3   :  { %18 = vsyncpa [#allocation4], 0 }
   0x4   :  { %19 = vsyncpa [#allocation6], 0 }
   0x5   :  { %20 = vsyncpa [#allocation9], 0  ;;  %s1678_s19 = smov [#allocation5]   ;;  %s1584_s23 = scalar_lea.hbm %s1920_s1, 7168 }
   0x6   :  { %s36_s20 = sshll.u32 %s1678_s19, 4  ;;  %p1585_p0 = scmp.ne.s32.totalorder %s1920_s1, %s1584_s23  ;;  %s37_s20 = int_to_ptr.vmem [resolvable:$true] %s36_s20 }
   0x7   :  { %p1588_p1 = scmp.lt.u32.totalorder %s1584_s23, %s1920_s1 }
   0x9   :  { %p1590_p2 = pnand %p1588_p1, %p1585_p0 }
   0xb   :  { %1593 = shalt.err (!%p1590_p2)
}
   0xc   :  { %s1594_s10 = scalar_lea.vmem %s37_s20, 7168  ;;  %p1599_p4 = scmp.lt.s32.totalorder %s37_s20, %s37_s20 }
   0xd   :  { %p1595_p3 = scmp.ne.s32.totalorder %s37_s20, %s1594_s10  ;;  %p1600_p5 = scmp.lt.s32.totalorder %s1594_s10, %s1594_s10 }
   0xf   :  { %p1601_p6 = por %p1600_p5, %p1599_p4 }
  0x11   :  { %p1602_p7 = pnand %p1601_p6, %p1595_p3 }
  0x13   :  { %1605 = shalt.err (!%p1602_p7)
}
  0x14   :  { %s1679_s28 = smov 64   ;;  %s1680_s29 = smov 4  }
  0x15   :  { %42 = dma.hbm_to_vmem [thread:$0]  %s1920_s1, 7168, %s37_s20, [#allocation6], %s1679_s28, %s1679_s28, %s1680_s29  }
  0x16   :  { %s1681_s13 = smov [#allocation3]   ;;  %s1682_s15 = smov [#allocation7]  }
  0x17   :  { %s27_s14 = sshll.u32 %s1681_s13, 4  ;;  %s54_s16 = sshll.u32 %s1682_s15, 4  ;;  %s28_s14 = int_to_ptr.vmem [resolvable:$true] %s27_s14  ;;  %s55_s16 = int_to_ptr.vmem [resolvable:$true] %s54_s16 }
  0x18   :  { %s1606_s19 = scalar_lea.hbm %s1919_s0, 896 }
  0x19   :  { %p1607_p8 = scmp.ne.s32.totalorder %s1919_s0, %s1606_s19  ;;  %p1610_p9 = scmp.lt.u32.totalorder %s1606_s19, %s1919_s0 }
  0x1b   :  { %p1612_p10 = pnand %p1610_p9, %p1607_p8 }
  0x1d   :  { %1615 = shalt.err (!%p1612_p10)
}
  0x1e   :  { %s1616_s1 = scalar_lea.vmem %s28_s14, 896  ;;  %p1621_p12 = scmp.lt.s32.totalorder %s28_s14, %s28_s14 }
  0x1f   :  { %p1617_p11 = scmp.ne.s32.totalorder %s28_s14, %s1616_s1  ;;  %p1622_p13 = scmp.lt.s32.totalorder %s1616_s1, %s1616_s1 }
  0x21   :  { %p1623_p0 = por %p1622_p13, %p1621_p12 }
  0x23   :  { %p1624_p1 = pnand %p1623_p0, %p1617_p11 }
  0x25   :  { %1627 = shalt.err (!%p1624_p1)
}
  0x26   :  { %30 = dma.hbm_to_vmem [thread:$0]  %s1919_s0, 896, %s28_s14, [#allocation4]  }
  0x27   :  { %s1628_s10 = scalar_lea.hbm %s1924_s5, 1024 }
  0x28   :  { %p1629_p2 = scmp.ne.s32.totalorder %s1924_s5, %s1628_s10  ;;  %p1632_p3 = scmp.lt.u32.totalorder %s1628_s10, %s1924_s5 }
  0x2a   :  { %p1634_p4 = pnand %p1632_p3, %p1629_p2 }
  0x2c   :  { %1637 = shalt.err (!%p1634_p4)
}
  0x2d   :  { %s1638_s17 = scalar_lea.vmem %s55_s16, 1024  ;;  %p1643_p6 = scmp.lt.s32.totalorder %s55_s16, %s55_s16 }
  0x2e   :  { %p1639_p5 = scmp.ne.s32.totalorder %s55_s16, %s1638_s17  ;;  %p1644_p7 = scmp.lt.s32.totalorder %s1638_s17, %s1638_s17 }
  0x30   :  { %p1645_p8 = por %p1644_p7, %p1643_p6 }
  0x32   :  { %p1646_p9 = pnand %p1645_p8, %p1639_p5 }
  0x34   :  { %1649 = shalt.err (!%p1646_p9)
}
  0x35   :  { %60 = dma.hbm_to_vmem [thread:$0]  %s1924_s5, 1024, %s55_s16, [#allocation6], %s1679_s28, %s1679_s28, %s1680_s29  }
  0x36   :  { %s1683_s18 = smov [#allocation8]   ;;  %s1650_s23 = scalar_lea.hbm %s1926_s7, 1024 }
  0x37   :  { %s68_s19 = sshll.u32 %s1683_s18, 4  ;;  %p1651_p10 = scmp.ne.s32.totalorder %s1926_s7, %s1650_s23  ;;  %s69_s19 = int_to_ptr.vmem [resolvable:$true] %s68_s19 }
  0x38   :  { %p1654_p11 = scmp.lt.u32.totalorder %s1650_s23, %s1926_s7 }
  0x3a   :  { %p1656_p12 = pnand %p1654_p11, %p1651_p10 }
  0x3c   :  { %1659 = shalt.err (!%p1656_p12)
}
  0x3d   :  { %s1660_s26 = scalar_lea.vmem %s69_s19, 1024  ;;  %p1665_p0 = scmp.lt.s32.totalorder %s69_s19, %s69_s19 }
  0x3e   :  { %p1661_p13 = scmp.ne.s32.totalorder %s69_s19, %s1660_s26  ;;  %p1666_p1 = scmp.lt.s32.totalorder %s1660_s26, %s1660_s26 }
  0x40   :  { %p1667_p2 = por %p1666_p1, %p1665_p0 }
  0x42   :  { %p1668_p3 = pnand %p1667_p2, %p1661_p13 }
  0x44   :  { %1671 = shalt.err (!%p1668_p3)
}
  0x45   :  { %74 = dma.hbm_to_vmem [thread:$0]  %s1926_s7, 1024, %s69_s19, [#allocation9], %s1679_s28, %s1679_s28, %s1680_s29  }
  0x46   :  { %1672 = dma.done.wait [#allocation4], 896  }
  0x47   :  { %1673 = vsyncadd [#allocation4], 4294966400 }
  0x48   :  { %1674 = dma.done.wait [#allocation6], 8192  }
  0x49   :  { %1675 = vsyncadd [#allocation6], 4294959104 }
  0x4a   :  { %1676 = dma.done.wait [#allocation9], 1024  }
  0x4b   :  { %1677 = vsyncadd [#allocation9], 4294966272  ;;  %v1496_v1 = vld [vmem:[#allocation5 + $0x40] sm:$0xff]   ;;  %v1500_v5 = vld [vmem:[#allocation5 + $0x48] sm:$0xff]   ;;  %v1684_v44 = vmov 0.0   ;;  %vm1685_vm0 = vmmov 0  }
  0x4c   :  { %v1497_v2 = vld [vmem:[#allocation5] sm:$0xff]   ;;  %1277 = vmatprep.subr.bf16.mxu0 %v1496_v1  ;;  %v1501_v6 = vld [vmem:[#allocation5 + $0x8] sm:$0xff]   ;;  %v1504_v9 = vld [vmem:[#allocation5 + $0x50] sm:$0xff]   ;;  %vm1175_vm1 = vcmask 7168  }
  0x4d   :  { %v1498_v3 = vld [vmem:[#allocation5 + $0xc0] sm:$0xff]   ;;  %1278 = vmatpush3.bf16.msra.mxu0 %v1497_v2  ;;  %v1502_v7 = vld [vmem:[#allocation5 + $0xc8] sm:$0xff]   ;;  %v1505_v10 = vld [vmem:[#allocation5 + $0x10] sm:$0xff]  }
  0x4e   :  { %v1499_v4 = vld [vmem:[#allocation5 + $0x80] sm:$0xff]   ;;  %1299 = vmatprep.subr.bf16.mxu1 %v1498_v3  ;;  %1279 = vmatprep.subr.bf16.mxu0 %v1500_v5  ;;  %v1503_v8 = vld [vmem:[#allocation5 + $0x88] sm:$0xff]   ;;  %v1506_v11 = vld [vmem:[#allocation5 + $0xd0] sm:$0xff]  }
  0x4f   :  { %1300 = vmatpush3.bf16.msra.mxu1 %v1499_v4  ;;  %v1507_v12 = vld [vmem:[#allocation5 + $0x90] sm:$0xff]   ;;  %v1508_v13 = vld [vmem:[#allocation5 + $0x58] sm:$0xff]   ;;  %v1512_v17 = vld [vmem:[#allocation5 + $0x60] sm:$0xff]  }
  0x50   :  { %1301 = vmatprep.subr.bf16.mxu1 %v1502_v7  ;;  %v1509_v14 = vld [vmem:[#allocation5 + $0x18] sm:$0xff]   ;;  %v1513_v18 = vld [vmem:[#allocation5 + $0x20] sm:$0xff]   ;;  %v1516_v21 = vld [vmem:[#allocation5 + $0x68] sm:$0xff]  }
  0x51   :  { %1280 = vmatpush3.bf16.msra.mxu0 %v1501_v6  ;;  %v1510_v15 = vld [vmem:[#allocation5 + $0xd8] sm:$0xff]   ;;  %v1514_v19 = vld [vmem:[#allocation5 + $0xe0] sm:$0xff]   ;;  %v1517_v22 = vld [vmem:[#allocation5 + $0x28] sm:$0xff]  }
  0x52   :  { %1281 = vmatprep.subr.bf16.mxu0 %v1504_v9  ;;  %v1511_v16 = vld [vmem:[#allocation5 + $0x98] sm:$0xff]   ;;  %v1515_v20 = vld [vmem:[#allocation5 + $0xa0] sm:$0xff]   ;;  %v1518_v23 = vld [vmem:[#allocation5 + $0xe8] sm:$0xff]  }
  0x53   :  { %1302 = vmatpush3.bf16.msra.mxu1 %v1503_v8  ;;  %v1519_v24 = vld [vmem:[#allocation5 + $0xa8] sm:$0xff]   ;;  %v1520_v25 = vld [vmem:[#allocation5 + $0x70] sm:$0xff]   ;;  %v1524_v29 = vld [vmem:[#allocation5 + $0x78] sm:$0xff]  }
  0x54   :  { %1303 = vmatprep.subr.bf16.mxu1 %v1506_v11  ;;  %v1521_v26 = vld [vmem:[#allocation5 + $0x30] sm:$0xff]   ;;  %v1525_v30 = vld [vmem:[#allocation5 + $0x38] sm:$0xff]   ;;  %v94_v35 = vld [vmem:[#allocation3] sm:$0xff] }
  0x55   :  { %1282 = vmatpush3.bf16.msra.mxu0 %v1505_v10  ;;  %v1522_v27 = vld [vmem:[#allocation5 + $0xf0] sm:$0xff]   ;;  %v1526_v31 = vld [vmem:[#allocation5 + $0xf8] sm:$0xff]   ;;  %v101_v36 = vpack.c.bf16 %v94_v35, %v94_v35  ;;  %v1528_v37 = vld [vmem:[#allocation5 + $0x140] sm:$0xff]  }
  0x56   :  { %1283 = vmatprep.subr.bf16.mxu0 %v1508_v13  ;;  %v1523_v28 = vld [vmem:[#allocation5 + $0xb0] sm:$0xff]   ;;  %v1527_v34 = vld [vmem:[#allocation5 + $0xb8] sm:$0xff]   ;;  %v97_v38 = vld [vmem:[#allocation3 + $0x18] sm:$0xff] }
  0x57   :  { %1304 = vmatpush3.bf16.msra.mxu1 %v1507_v12  ;;  %v95_v32 = vld [vmem:[#allocation3 + $0x8] sm:$0xff]  ;;  %v104_v39 = vpack.c.bf16 %v97_v38, %v97_v38  ;;  %v1529_v40 = vld [vmem:[#allocation5 + $0x100] sm:$0xff]   ;;  %v96_v41 = vld [vmem:[#allocation3 + $0x10] sm:$0xff] }
  0x58   :  { %1305 = vmatprep.subr.bf16.mxu1 %v1510_v15  ;;  %v102_v33 = vpack.c.bf16 %v95_v32, %v95_v32  ;;  %v103_v42 = vpack.c.bf16 %v96_v41, %v96_v41  ;;  %v1530_v43 = vld [vmem:[#allocation5 + $0x180] sm:$0xff]   ;;  %v1531_v45 = vld [vmem:[#allocation5 + $0x148] sm:$0xff]   ;;  %v1534_v48 = vld [vmem:[#allocation5 + $0x150] sm:$0xff]  }
  0x59   :  { %1284 = vmatpush3.bf16.msra.mxu0 %v1509_v14  ;;  %635 = vmatprep.mubr.bf16.mxu1 %v104_v39  ;;  %v1532_v46 = vld [vmem:[#allocation5 + $0x108] sm:$0xff]   ;;  %v1535_v49 = vld [vmem:[#allocation5 + $0x110] sm:$0xff]   ;;  %v1537_v51 = vld [vmem:[#allocation5 + $0x158] sm:$0xff]  }
  0x5a   :  { %1285 = vmatprep.subr.bf16.mxu0 %v1512_v17  ;;  %595 = vmatprep.mubr.bf16.mxu0 %v102_v33  ;;  %v1533_v47 = vld [vmem:[#allocation5 + $0x188] sm:$0xff]   ;;  %v1536_v50 = vld [vmem:[#allocation5 + $0x190] sm:$0xff]   ;;  %v1538_v52 = vld [vmem:[#allocation5 + $0x118] sm:$0xff]  }
  0x5b   :  { %1306 = vmatpush3.bf16.msra.mxu1 %v1511_v16  ;;  %v1540_v53 = vld [vmem:[#allocation5 + $0x160] sm:$0xff]   ;;  %v1539_v54 = vld [vmem:[#allocation5 + $0x198] sm:$0xff]   ;;  %v1543_v56 = vld [vmem:[#allocation5 + $0x168] sm:$0xff]  }
  0x5c   :  { %1307 = vmatprep.subr.bf16.mxu1 %v1514_v19  ;;  %v1541_v55 = vld [vmem:[#allocation5 + $0x120] sm:$0xff]   ;;  %v1544_v58 = vld [vmem:[#allocation5 + $0x128] sm:$0xff]   ;;  %v1546_v59 = vld [vmem:[#allocation5 + $0x170] sm:$0xff]  }
  0x5d   :  { %1286 = vmatpush3.bf16.msra.mxu0 %v1513_v18  ;;  %v1542_v57 = vld [vmem:[#allocation5 + $0x1a0] sm:$0xff]   ;;  %v1545_v60 = vld [vmem:[#allocation5 + $0x1a8] sm:$0xff]   ;;  %v1547_v61 = vld [vmem:[#allocation5 + $0x130] sm:$0xff]  }
  0x5e   :  { %1287 = vmatprep.subr.bf16.mxu0 %v1516_v21  ;;  %v99_v62 = vld [vmem:[#allocation3 + $0x28] sm:$0xff]  ;;  %v1549_v0 = vld [vmem:[#allocation5 + $0x178] sm:$0xff]   ;;  %v98_v3 = vld [vmem:[#allocation3 + $0x20] sm:$0xff] }
  0x5f   :  { %1308 = vmatpush3.bf16.msra.mxu1 %v1515_v20  ;;  %v1548_v63 = vld [vmem:[#allocation5 + $0x1b0] sm:$0xff]   ;;  %v106_v1 = vpack.c.bf16 %v99_v62, %v99_v62  ;;  %v1550_v2 = vld [vmem:[#allocation5 + $0x138] sm:$0xff]   ;;  %v105_v6 = vpack.c.bf16 %v98_v3, %v98_v3  ;;  %v1552_v8 = vld [vmem:[%s1922_s3] sm:$0xff]  }
  0x60   :  { %1309 = vmatprep.subr.bf16.mxu1 %v1518_v23  ;;  %v1551_v4 = vld [vmem:[#allocation5 + $0x1b8] sm:$0xff]   ;;  %v1553_v9 = vld [vmem:[%s1922_s3 + $0x8] sm:$0xff]   ;;  %v1556_v12 = vld [vmem:[%s1922_s3 + $0x20] sm:$0xff]  }
  0x61   :  { %1288 = vmatpush3.bf16.msra.mxu0 %v1517_v22  ;;  %v100_v5 = vld [vmem:[#allocation3 + $0x30] sm:$0xff]  ;;  %v1557_v13 = vld [vmem:[%s1922_s3 + $0x28] sm:$0xff]   ;;  %v1560_v16 = vld [vmem:[#allocation7] sm:$0xff]  }
  0x62   :  { %1289 = vmatprep.subr.bf16.mxu0 %v1520_v25  ;;  %v107_v7 = vpack.c.bf16 %v100_v5, %v100_v5  ;;  %v1554_v10 = vld [vmem:[%s1922_s3 + $0x10] sm:$0xff]   ;;  %v1555_v11 = vld [vmem:[%s1922_s3 + $0x18] sm:$0xff]   ;;  %v1561_v17 = vld [vmem:[#allocation7 + $0x8] sm:$0xff]  }
  0x63   :  { %1310 = vmatpush3.bf16.msra.mxu1 %v1519_v24  ;;  %v1558_v14 = vld [vmem:[%s1922_s3 + $0x30] sm:$0xff]   ;;  %v1559_v15 = vld [vmem:[%s1922_s3 + $0x38] sm:$0xff]   ;;  %v1565_v21 = vld [vmem:[#allocation7 + $0x28] sm:$0xff]  }
  0x64   :  { %1311 = vmatprep.subr.bf16.mxu1 %v1522_v27  ;;  %v1562_v18 = vld [vmem:[#allocation7 + $0x10] sm:$0xff]   ;;  %v1563_v19 = vld [vmem:[#allocation7 + $0x18] sm:$0xff]   ;;  %v1564_v20 = vld [vmem:[#allocation7 + $0x20] sm:$0xff]  }
  0x65   :  { %1290 = vmatpush3.bf16.msra.mxu0 %v1521_v26  ;;  %v1184_v23 = vld [vmem:[%s1921_s2] ss:$0 sm:$0xff]  ;;  %v1578_v5 = vld [vmem:[%s1928_s9 + $0x10] sm:$0xff]  }
  0x66   :  { %1291 = vmatprep.subr.bf16.mxu0 %v1524_v29  ;;  %v1576_v3 = vld [vmem:[%s1928_s9] sm:$0xff]  }
  0x67   :  { %1312 = vmatpush3.bf16.msra.mxu1 %v1523_v28 }
  0x68   :  { %1313 = vmatprep.subr.bf16.mxu1 %v1526_v31 }
  0x69   :  { %1292 = vmatpush3.bf16.msra.mxu0 %v1525_v30 }
  0x6a   :  { %1321 = vmatprep.subr.bf16.mxu0 %v1528_v37 }
  0x6b   :  { %1314 = vmatpush3.bf16.msra.mxu1 %v1527_v34 }
  0x6c   :  { %596 = vmatmul.mubr.bf16.vlgmr.msra.gmra.mrb[0].mxu0 %v101_v36  ;;  %1388 = vmatprep.subr.bf16.mxu1 %v1684_v44 }
  0x6d   :  { %1322 = vmatpush3.bf16.msra.mxu0 %v1529_v40  ;;  %675 = vmatprep.mubr.bf16.mxu0 %v106_v1  ;;  %v1574_v1 = vld [vmem:[#allocation8 + $0x30] sm:$0xff]  }
  0x6e   :  { %636 = vmatmul.mubr.bf16.vlgmr.msra.gmra.mrb[0].mxu1 %v103_v42  ;;  %1323 = vmatprep.subr.bf16.mxu0 %v1531_v45 }
  0x6f   :  { %1389 = vmatpush3.bf16.msra.mxu1 %v1530_v43  ;;  %1404 = vmatprep.mubr.msk.bf16.mxu1 %vm1685_vm0, %v1684_v44 }
  0x70   :  { %1390 = vmatprep.subr.bf16.mxu1 %v1684_v44 }
  0x71   :  { %1324 = vmatpush3.bf16.msra.mxu0 %v1532_v46 }
  0x72   :  { %1325 = vmatprep.subr.bf16.mxu0 %v1534_v48 }
  0x73   :  { %1391 = vmatpush3.bf16.msra.mxu1 %v1533_v47 }
  0x74   :  { %1392 = vmatprep.subr.bf16.mxu1 %v1684_v44 }
  0x75   :  { %1326 = vmatpush3.bf16.msra.mxu0 %v1535_v49  ;;  %v1566_v49 = vld [vmem:[#allocation7 + $0x30] sm:$0xff]  }
  0x76   :  { %1327 = vmatprep.subr.bf16.mxu0 %v1537_v51  ;;  %v1568_v51 = vld [vmem:[#allocation8] sm:$0xff]  }
  0x77   :  { %1393 = vmatpush3.bf16.msra.mxu1 %v1536_v50  ;;  %v1567_v50 = vld [vmem:[#allocation7 + $0x38] sm:$0xff]  }
  0x78   :  { %1394 = vmatprep.subr.bf16.mxu1 %v1684_v44 }
  0x79   :  { %1328 = vmatpush3.bf16.msra.mxu0 %v1538_v52  ;;  %v1569_v52 = vld [vmem:[#allocation8 + $0x8] sm:$0xff]  }
  0x7a   :  { %1329 = vmatprep.subr.bf16.mxu0 %v1540_v53  ;;  %v1570_v53 = vld [vmem:[#allocation8 + $0x10] sm:$0xff]  }
  0x7b   :  { %1395 = vmatpush3.bf16.msra.mxu1 %v1539_v54  ;;  %v1571_v54 = vld [vmem:[#allocation8 + $0x18] sm:$0xff]  }
  0x7c   :  { %1396 = vmatprep.subr.bf16.mxu1 %v1684_v44 }
  0x7d   :  { %1330 = vmatpush3.bf16.msra.mxu0 %v1541_v55  ;;  %v1572_v55 = vld [vmem:[#allocation8 + $0x20] sm:$0xff]  }
  0x7e   :  { %1331 = vmatprep.subr.bf16.mxu0 %v1543_v56  ;;  %v1573_v56 = vld [vmem:[#allocation8 + $0x28] sm:$0xff]  }
  0x7f   :  { %1397 = vmatpush3.bf16.msra.mxu1 %v1542_v57  ;;  %v1241_v57 = vld [vmem:[%s1923_s4] ss:$0 sm:$0xff] }
  0x80   :  { %1398 = vmatprep.subr.bf16.mxu1 %v1684_v44 }
  0x81   :  { %1332 = vmatpush3.bf16.msra.mxu0 %v1544_v58 }
  0x82   :  { %1333 = vmatprep.subr.bf16.mxu0 %v1546_v59 }
  0x83   :  { %1399 = vmatpush3.bf16.msra.mxu1 %v1545_v60 }
  0x84   :  { %1400 = vmatprep.subr.bf16.mxu1 %v1684_v44 }
  0x85   :  { %1334 = vmatpush3.bf16.msra.mxu0 %v1547_v61 }
  0x86   :  { %1335 = vmatprep.subr.bf16.mxu0 %v1549_v0 }
  0x87   :  { %1401 = vmatpush3.bf16.msra.mxu1 %v1548_v63 }
  0x88   :  { %1402 = vmatprep.subr.bf16.mxu1 %v1684_v44 }
  0x89   :  { %1336 = vmatpush3.bf16.msra.mxu0 %v1550_v2  ;;  %v1575_v2 = vld [vmem:[#allocation8 + $0x38] sm:$0xff]  }
  0x8a   :  { %1408 = vmatprep.subr.bf16.mxu0 %v1684_v44 }
  0x8b   :  { %1403 = vmatpush3.bf16.msra.mxu1 %v1551_v4  ;;  %v1577_v4 = vld [vmem:[%s1928_s9 + $0x8] sm:$0xff]  }
  0x8c   :  { %676 = vmatmul.mubr.bf16.vlgmr.msra.gmra.mrb[4].mxu0 %v105_v6  ;;  %1428 = vmatprep.subr.bf16.mxu1 %v1684_v44  ;;  %v1579_v6 = vld [vmem:[%s1928_s9 + $0x18] sm:$0xff]  }
  0x8d   :  { %1424 = vmatprep.mubr.msk.bf16.mxu0 %vm1685_vm0, %v1684_v44  ;;  %1409 = vmatpush3.bf16.msra.mxu0 %v1552_v8  ;;  %v1581_v8 = vld [vmem:[%s1928_s9 + $0x28] sm:$0xff]  }
  0x8e   :  { %1405 = vmatmul.mubr.bf16.vlgmr.msra.gmra.mrb[4].mxu1 %v107_v7  ;;  %1410 = vmatprep.subr.bf16.mxu0 %v1684_v44  ;;  %v1580_v7 = vld [vmem:[%s1928_s9 + $0x20] sm:$0xff]  }
  0x8f   :  { %1444 = vmatprep.mubr.msk.bf16.mxu1 %vm1685_vm0, %v1684_v44  ;;  %1429 = vmatpush3.bf16.msra.mxu1 %v1560_v16 }
  0x90   :  { %1430 = vmatprep.subr.bf16.mxu1 %v1684_v44 }
  0x91   :  { %1411 = vmatpush3.bf16.msra.mxu0 %v1553_v9  ;;  %v1250_v9 = vld [vmem:[%s1925_s6] ss:$0 sm:$0xff] }
  0x92   :  { %1412 = vmatprep.subr.bf16.mxu0 %v1684_v44 }
  0x93   :  { %1431 = vmatpush3.bf16.msra.mxu1 %v1561_v17  ;;  %v1582_v17 = vld [vmem:[%s1928_s9 + $0x30] sm:$0xff]  }
  0x94   :  { %1432 = vmatprep.subr.bf16.mxu1 %v1684_v44 }
  0x95   :  { %1413 = vmatpush3.bf16.msra.mxu0 %v1554_v10 }
  0x96   :  { %1414 = vmatprep.subr.bf16.mxu0 %v1684_v44 }
  0x97   :  { %1433 = vmatpush3.bf16.msra.mxu1 %v1562_v18  ;;  %v1583_v18 = vld [vmem:[%s1928_s9 + $0x38] sm:$0xff]  }
  0x98   :  { %1434 = vmatprep.subr.bf16.mxu1 %v1684_v44 }
  0x99   :  { %1415 = vmatpush3.bf16.msra.mxu0 %v1555_v11 }
  0x9a   :  { %1416 = vmatprep.subr.bf16.mxu0 %v1684_v44 }
  0x9b   :  { %1435 = vmatpush3.bf16.msra.mxu1 %v1563_v19  ;;  %v1259_v19 = vld [vmem:[%s1927_s8] ss:$0 sm:$0xff] }
  0x9c   :  { %1436 = vmatprep.subr.bf16.mxu1 %v1684_v44 }
  0x9d   :  { %1417 = vmatpush3.bf16.msra.mxu0 %v1556_v12 }
  0x9e   :  { %1418 = vmatprep.subr.bf16.mxu0 %v1684_v44 }
  0x9f   :  { %1437 = vmatpush3.bf16.msra.mxu1 %v1564_v20 }
  0xa0   :  { %1438 = vmatprep.subr.bf16.mxu1 %v1684_v44 }
  0xa1   :  { %1419 = vmatpush3.bf16.msra.mxu0 %v1557_v13 }
  0xa2   :  { %1420 = vmatprep.subr.bf16.mxu0 %v1684_v44 }
  0xa3   :  { %1439 = vmatpush3.bf16.msra.mxu1 %v1565_v21 }
  0xa4   :  { %1440 = vmatprep.subr.bf16.mxu1 %v1684_v44 }
  0xa5   :  { %1421 = vmatpush3.bf16.msra.mxu0 %v1558_v14 }
  0xa6   :  { %1422 = vmatprep.subr.bf16.mxu0 %v1684_v44 }
  0xa7   :  { %1441 = vmatpush3.bf16.msra.mxu1 %v1566_v49 }
  0xa8   :  { %1442 = vmatprep.subr.bf16.mxu1 %v1684_v44 }
  0xa9   :  { %1423 = vmatpush3.bf16.msra.mxu0 %v1559_v15 }
  0xaa   :  { %1448 = vmatprep.subr.bf16.mxu0 %v1684_v44 }
  0xab   :  { %1443 = vmatpush3.bf16.msra.mxu1 %v1567_v50 }
  0xac   :  { %1468 = vmatprep.subr.bf16.mxu1 %v1684_v44 }
 0x13f   :  { %v1293_v22 = vpop.f32.mrb[0].mxu0 }
 0x140   :  { %v1294_v24 = vpop.f32.mrb[1].mxu0 }
 0x141   :  { %v1295_v25 = vadd.f32 %v1294_v24, %v1293_v22  ;;  %v1296_v26 = vpop.f32.mrb[2].mxu0  ;;  %v1315_v27 = vpop.f32.mrb[0].mxu1 }
 0x142   :  { %v1297_v28 = vpop.f32.mrb[3].mxu0  ;;  %v1316_v30 = vpop.f32.mrb[1].mxu1 }
 0x143   :  { %v598_v29 = vadd.f32 %v1295_v25, %v1184_v23  ;;  %v1317_v31 = vadd.f32 %v1316_v30, %v1315_v27  ;;  %v1318_v32 = vpop.f32.mrb[2].mxu1  ;;  %v1268_v27 = vld [vmem:[#allocation2] ss:$0 sm:$0xff] }
 0x144   :  { %v1319_v33 = vpop.f32.mrb[3].mxu1 }
 0x145   :  { %v638_v34 = vadd.f32 %v1317_v31, %v598_v29 }
 0x15f   :  { %v1337_v35 = vpop.f32.mrb[4].mxu0 }
 0x160   :  { %v1338_v36 = vpop.f32.mrb[5].mxu0 }
 0x161   :  { %v1339_v37 = vadd.f32 %v1338_v36, %v1337_v35  ;;  %v1340_v38 = vpop.f32.mrb[6].mxu0  ;;  %v717_v39 = vpop.f32.mrb[4].mxu1 }
 0x162   :  { %v1341_v40 = vpop.f32.mrb[7].mxu0  ;;  %v1406_v42 = vpop.f32.mrb[5].mxu1 }
 0x163   :  { %v678_v41 = vadd.f32 %v1339_v37, %v638_v34  ;;  %v720_v43 = vpop.f32.mrb[6].mxu1 }
 0x164   :  { %v1407_v46 = vpop.f32.mrb[7].mxu1 }
 0x165   :  { %v718_v45 = vadd.f32 %v717_v39, %v678_v41 }
 0x167   :  { %v723_v47 = vmax.f32 %v718_v45, 0.0 }
 0x169   :  { %v724_v48 = vpack.c.bf16 %v723_v47, %v723_v47 }
 0x16b   :  { %1425 = vmatmul.mubr.bf16.vlgmr.msra.gmra.mrb[8].mxu0 %v724_v48 }
 0x16c   :  { %1464 = vmatprep.mubr.msk.bf16.mxu0 %vm1685_vm0, %v1684_v44  ;;  %1449 = vmatpush3.bf16.msra.mxu0 %v1568_v51 }
 0x16d   :  { %1450 = vmatprep.subr.bf16.mxu0 %v1684_v44 }
 0x170   :  { %1451 = vmatpush3.bf16.msra.mxu0 %v1569_v52 }
 0x171   :  { %1452 = vmatprep.subr.bf16.mxu0 %v1684_v44 }
 0x174   :  { %1453 = vmatpush3.bf16.msra.mxu0 %v1570_v53 }
 0x175   :  { %1454 = vmatprep.subr.bf16.mxu0 %v1684_v44 }
 0x178   :  { %1455 = vmatpush3.bf16.msra.mxu0 %v1571_v54 }
 0x179   :  { %1456 = vmatprep.subr.bf16.mxu0 %v1684_v44 }
 0x17c   :  { %1457 = vmatpush3.bf16.msra.mxu0 %v1572_v55 }
 0x17d   :  { %1458 = vmatprep.subr.bf16.mxu0 %v1684_v44 }
 0x180   :  { %1459 = vmatpush3.bf16.msra.mxu0 %v1573_v56 }
 0x181   :  { %1460 = vmatprep.subr.bf16.mxu0 %v1684_v44 }
 0x184   :  { %1461 = vmatpush3.bf16.msra.mxu0 %v1574_v1 }
 0x185   :  { %1462 = vmatprep.subr.bf16.mxu0 %v1684_v44 }
 0x188   :  { %1463 = vmatpush3.bf16.msra.mxu0 %v1575_v2 }
 0x23e   :  { %v830_v58 = vpop.f32.mrb[8].mxu0 }
 0x23f   :  { %v831_v59 = vadd.f32 %v1241_v57, %v830_v58  ;;  %v1426_v60 = vpop.f32.mrb[9].mxu0 }
 0x240   :  { %v833_v61 = vpop.f32.mrb[10].mxu0 }
 0x241   :  { %v836_v62 = vmax.f32 %v831_v59, 0.0  ;;  %v1427_v63 = vpop.f32.mrb[11].mxu0 }
 0x243   :  { %v837_v0 = vpack.c.bf16 %v836_v62, %v836_v62 }
 0x245   :  { %1445 = vmatmul.mubr.bf16.vlgmr.msra.gmra.mrb[8].mxu1 %v837_v0 }
 0x246   :  { %1484 = vmatprep.mubr.msk.bf16.mxu1 %vm1685_vm0, %v1684_v44  ;;  %1469 = vmatpush3.bf16.msra.mxu1 %v1576_v3 }
 0x247   :  { %1470 = vmatprep.subr.bf16.mxu1 %v1684_v44 }
 0x24a   :  { %1471 = vmatpush3.bf16.msra.mxu1 %v1577_v4 }
 0x24b   :  { %1472 = vmatprep.subr.bf16.mxu1 %v1684_v44 }
 0x24e   :  { %1473 = vmatpush3.bf16.msra.mxu1 %v1578_v5 }
 0x24f   :  { %1474 = vmatprep.subr.bf16.mxu1 %v1684_v44 }
 0x252   :  { %1475 = vmatpush3.bf16.msra.mxu1 %v1579_v6 }
 0x253   :  { %1476 = vmatprep.subr.bf16.mxu1 %v1684_v44 }
 0x256   :  { %1477 = vmatpush3.bf16.msra.mxu1 %v1580_v7 }
 0x257   :  { %1478 = vmatprep.subr.bf16.mxu1 %v1684_v44 }
 0x25a   :  { %1479 = vmatpush3.bf16.msra.mxu1 %v1581_v8 }
 0x25b   :  { %1480 = vmatprep.subr.bf16.mxu1 %v1684_v44 }
 0x25e   :  { %1481 = vmatpush3.bf16.msra.mxu1 %v1582_v17 }
 0x25f   :  { %1482 = vmatprep.subr.bf16.mxu1 %v1684_v44 }
 0x262   :  { %1483 = vmatpush3.bf16.msra.mxu1 %v1583_v18 }
 0x318   :  { %v943_v10 = vpop.f32.mrb[8].mxu1 }
 0x319   :  { %v944_v11 = vadd.f32 %v1250_v9, %v943_v10  ;;  %v1446_v12 = vpop.f32.mrb[9].mxu1 }
 0x31a   :  { %v946_v13 = vpop.f32.mrb[10].mxu1 }
 0x31b   :  { %v949_v14 = vmax.f32 %v944_v11, 0.0  ;;  %v1447_v15 = vpop.f32.mrb[11].mxu1 }
 0x31d   :  { %v950_v16 = vpack.c.bf16 %v949_v14, %v949_v14 }
 0x31f   :  { %1465 = vmatmul.mubr.bf16.vlgmr.msra.gmra.mrb[12].mxu0 %v950_v16 }
 0x3f2   :  { %v1056_v20 = vpop.f32.mrb[12].mxu0 }
 0x3f3   :  { %v1057_v21 = vadd.f32 %v1259_v19, %v1056_v20  ;;  %v1466_v22 = vpop.f32.mrb[13].mxu0 }
 0x3f4   :  { %v1059_v23 = vpop.f32.mrb[14].mxu0 }
 0x3f5   :  { %v1062_v24 = vmax.f32 %v1057_v21, 0.0  ;;  %v1467_v25 = vpop.f32.mrb[15].mxu0 }
 0x3f7   :  { %v1063_v26 = vpack.c.bf16 %v1062_v24, %v1062_v24 }
 0x3f9   :  { %1485 = vmatmul.mubr.bf16.vlgmr.msra.gmra.mrb[12].mxu1 %v1063_v26 }
 0x4cc   :  { %v1169_v28 = vpop.f32.mrb[12].mxu1 }
 0x4cd   :  { %v1170_v44 = vadd.f32 %v1268_v27, %v1169_v28  ;;  %v1486_v29 = vpop.f32.mrb[13].mxu1 }
 0x4ce   :  { %v1172_v30 = vpop.f32.mrb[14].mxu1 }
 0x4cf   :  { %1176 = vst.msk [vmem:[%s1930_s11] sm:$0xff] %vm1175_vm1, %v1170_v44  ;;  %v1487_v31 = vpop.f32.mrb[15].mxu1 }
 0x4d0   :  { %1181 = vsyncpa [#allocation4], 1 }
 0x4d1   :  { %1182 = vsyncpa [#allocation6], 1 }
 0x4d2   :  { %1183 = vsyncpa [#allocation9], 1 }

</bundles_post_ra>
